<compile_context>
chip_gen: v7x
topology: tpu7x:2x2x1
jax: 0.10.0
libtpu: 0.0.40
codegen_flags: <defaults>
</compile_context>

<pallas_src>
import jax
import jax.numpy as jnp
from jax.experimental import pallas as pl
from jax.experimental.pallas import tpu as pltpu

EPS = 1e-5


def _mm(x, w):
    # bf16 MXU matmul with f32 accumulation.
    return jnp.dot(x.astype(w.dtype), w, preferred_element_type=jnp.float32)


def _relu(x):
    return jnp.maximum(x, 0.0)


def _layernorm(x, g, b):
    # one-pass statistics: var = E[x^2] - mu^2 (halves the cross-lane reductions)
    n = x.shape[-1]
    s1 = jnp.sum(x, axis=-1, keepdims=True)
    s2 = jnp.sum(x * x, axis=-1, keepdims=True)
    mu = s1 * (1.0 / n)
    var = jnp.maximum(s2 * (1.0 / n) - mu * mu, 0.0)
    return (x - mu) * jax.lax.rsqrt(var + EPS) * g + b


def _dad_kernel(
    d_ref, o_ref,                         # (Bb, D) f32, (Bb, 1) f32  (one time step)
    w0_ref, w_eh_ref, w_he_ref, wtx_ref, w6_ref,     # bf16 weights
    ln_e_ref, ln_h_ref, b_e_ref, b_h_ref, b6_ref,    # packed f32 LN params / biases
    out_ref,                              # (Bb, D) f32
    acc_ref,                              # (Bb, E) f32 scratch, persists across t
):
    s = pl.program_id(1)

    @pl.when(s == 0)
    def _():
        acc_ref[...] = jnp.zeros_like(acc_ref)

    x = d_ref[...]                        # (Bb, D)
    y = o_ref[...]                        # (Bb, 1)

    lnE = ln_e_ref[...]                   # (6, E): [g0, be0, g2, be2, g4, be4]
    lnH = ln_h_ref[...]                   # (4, H): [g1, be1, g3, be3]
    bE = b_e_ref[...]                     # (4, E): [b0, b2, b4, bt_eff]
    bH = b_h_ref[...]                     # (3, H): [b1, b3, b5]

    # encode_designs: Linear -> LayerNorm -> ReLU
    enc = _relu(_layernorm(_mm(x, w0_ref[...]) + bE[0:1], lnE[0:1], lnE[1:2]))

    def head(wh_i, bh_i, gh_i, beh_i, we_i, be_i, ge_i, bee_i):
        h = _relu(_layernorm(_mm(enc, w_eh_ref[wh_i]) + bH[bh_i:bh_i + 1],
                             lnH[gh_i:gh_i + 1], lnH[beh_i:beh_i + 1]))
        return _relu(_layernorm(_mm(h, w_he_ref[we_i]) + bE[be_i:be_i + 1],
                                lnE[ge_i:ge_i + 1], lnE[bee_i:bee_i + 1]))

    x0 = head(0, 0, 0, 1, 0, 1, 2, 3)     # head0: w1,b1,g1,be1, w2,b2,g2,be2
    x1 = head(1, 1, 2, 3, 1, 2, 4, 5)     # head1: w3,b3,g3,be3, w4,b4,g4,be4

    # gated mix, accumulated over the t (reduction) grid axis
    acc_ref[...] += x0 + y * (x1 - x0)

    @pl.when(s == pl.num_programs(1) - 1)
    def _():
        xs = acc_ref[...]                                  # (Bb, E)
        # time projection with the temb term pre-folded into bE[3]
        xp = _mm(xs, wtx_ref[...]) + bE[3:4]               # (Bb, E)
        # decode_designs: Linear -> ReLU -> Linear
        h = _relu(_mm(xp, w_eh_ref[2]) + bH[2:3])          # (Bb, H)
        out_ref[...] = (_mm(h, w6_ref[...]) + b6_ref[...]).astype(out_ref.dtype)


def init_params(key, design_shape, T, hidden_dim, embedding_dim):
    ks = jax.random.split(key, 20)

    def lin_w(k, fan_in, fan_out):
        return (0.1 * jax.random.normal(k, (fan_in, fan_out), jnp.float32),
                0.1 * jax.random.normal(jax.random.fold_in(k, 1), (1, fan_out), jnp.float32))

    def ln_p(k, dim):
        return (1.0 + 0.1 * jax.random.normal(k, (1, dim), jnp.float32),
                0.1 * jax.random.normal(jax.random.fold_in(k, 1), (1, dim), jnp.float32))

    D, H, E = design_shape, hidden_dim, embedding_dim
    p = {}
    p["w0"], p["b0"] = lin_w(ks[0], D, E)
    p["g0"], p["be0"] = ln_p(ks[1], E)
    # head0
    p["w1"], p["b1"] = lin_w(ks[2], E, H)
    p["g1"], p["be1"] = ln_p(ks[3], H)
    p["w2"], p["b2"] = lin_w(ks[4], H, E)
    p["g2"], p["be2"] = ln_p(ks[5], E)
    # head1
    p["w3"], p["b3"] = lin_w(ks[6], E, H)
    p["g3"], p["be3"] = ln_p(ks[7], H)
    p["w4"], p["b4"] = lin_w(ks[8], H, E)
    p["g4"], p["be4"] = ln_p(ks[9], E)
    # time projection: Linear(2E -> E)
    p["wt_full"], p["bt"] = lin_w(ks[10], 2 * E, E)
    p["time_embeddings"] = jax.random.uniform(ks[11], (T, E), jnp.float32)
    # decode_designs
    p["w5"], p["b5"] = lin_w(ks[12], E, H)
    p["w6"], p["b6"] = lin_w(ks[13], H, D)
    return p


def deep_adaptive_design(designs, outcomes, params, *, batch_block=512):
    """designs: (B, t, D) f32; outcomes: (B, t, 1) f32 -> (B, D) f32."""
    B, t, D = designs.shape
    E = params["g0"].shape[-1]
    H = params["g1"].shape[-1]
    T = params["time_embeddings"].shape[0]
    # PyTorch indexes time_embeddings[t]; t == T would be out of bounds there.
    assert t < T, "sequence length t must be < T (time_embeddings[t])"

    wdt = jnp.bfloat16

    # step-major layout: each grid step streams one contiguous (Bb, D) slab
    dT = jnp.transpose(designs, (1, 0, 2)).astype(jnp.float32)    # (t, B, D)
    oT = jnp.transpose(outcomes, (1, 0, 2)).astype(jnp.float32)   # (t, B, 1)

    # fold the constant time-embedding term into an effective bias (f32)
    temb = params["time_embeddings"][t][None, :]                  # (1, E)
    wtt = params["wt_full"][E:, :]                                # (E, E)
    bt_eff = temb @ wtt + params["bt"]                            # (1, E)

    # packed bf16 weights
    w0 = params["w0"].astype(wdt)                                             # (D, E)
    w_eh = jnp.stack([params["w1"], params["w3"], params["w5"]]).astype(wdt)  # (3, E, H)
    w_he = jnp.stack([params["w2"], params["w4"]]).astype(wdt)                # (2, H, E)
    wtx = params["wt_full"][:E, :].astype(wdt)                                # (E, E)
    w6 = params["w6"].astype(wdt)                                             # (H, D)

    # packed f32 LayerNorm params and biases
    ln_e = jnp.concatenate([params["g0"], params["be0"], params["g2"],
                            params["be2"], params["g4"], params["be4"]], axis=0)  # (6, E)
    ln_h = jnp.concatenate([params["g1"], params["be1"],
                            params["g3"], params["be3"]], axis=0)                 # (4, H)
    b_e = jnp.concatenate([params["b0"], params["b2"], params["b4"], bt_eff], axis=0)  # (4, E)
    b_h = jnp.concatenate([params["b1"], params["b3"], params["b5"]], axis=0)          # (3, H)
    b6 = params["b6"]                                                                   # (1, D)

    Bb = min(B, batch_block)
    grid = (pl.cdiv(B, Bb), t)

    def const(shape):
        return pl.BlockSpec(shape, lambda i, s, _n=len(shape): (0,) * _n)

    in_specs = [
        pl.BlockSpec((None, Bb, D), lambda i, s: (s, i, 0)),   # designs (step-major)
        pl.BlockSpec((None, Bb, 1), lambda i, s: (s, i, 0)),   # outcomes
        const((D, E)),        # w0
        const((3, E, H)),     # w1 / w3 / w5
        const((2, H, E)),     # w2 / w4
        const((E, E)),        # wtx
        const((H, D)),        # w6
        const((6, E)),        # LN(E) gammas/betas
        const((4, H)),        # LN(H) gammas/betas
        const((4, E)),        # E-sized biases (incl. folded time bias)
        const((3, H)),        # H-sized biases
        const((1, D)),        # b6
    ]
    out_specs = pl.BlockSpec((Bb, D), lambda i, s: (i, 0))

    return pl.pallas_call(
        _dad_kernel,
        out_shape=jax.ShapeDtypeStruct((B, D), jnp.float32),
        grid_spec=pltpu.PrefetchScalarGridSpec(
            num_scalar_prefetch=0,
            grid=grid,
            in_specs=in_specs,
            out_specs=out_specs,
            scratch_shapes=[pltpu.VMEM((Bb, E), jnp.float32)],
        ),
        compiler_params=pltpu.CompilerParams(
            dimension_semantics=("parallel", "arbitrary")),
    )(dT, oT, w0, w_eh, w_he, wtx, w6, ln_e, ln_h, b_e, b_h, b6)


def reference(designs, outcomes, params):
    """Pure-JAX f32 reference mirroring the PyTorch forward."""
    B, t, D = designs.shape
    E = params["g0"].shape[-1]

    def ln(x, g, b):
        mu = jnp.mean(x, axis=-1, keepdims=True)
        var = jnp.mean((x - mu) ** 2, axis=-1, keepdims=True)
        return (x - mu) / jnp.sqrt(var + EPS) * g + b

    relu = lambda z: jnp.maximum(z, 0.0)
    lin = lambda z, w, b: z @ w + b

    enc = relu(ln(lin(designs, params["w0"], params["b0"]), params["g0"], params["be0"]))

    def head(e, a, b):
        h = relu(ln(lin(e, params[f"w{a}"], params[f"b{a}"]),
                    params[f"g{a}"], params[f"be{a}"]))
        return relu(ln(lin(h, params[f"w{b}"], params[f"b{b}"]),
                       params[f"g{b}"], params[f"be{b}"]))

    x0 = head(enc, 1, 2)
    x1 = head(enc, 3, 4)
    x = outcomes * x1 + (1.0 - outcomes) * x0
    x = x.sum(axis=1)
    temb = jnp.broadcast_to(params["time_embeddings"][t], x.shape)
    x = jnp.concatenate([x, temb], axis=-1) @ params["wt_full"] + params["bt"]
    h = relu(x @ params["w5"] + params["b5"])
    return h @ params["w6"] + params["b6"]


if __name__ == "__main__":
    B, t, D = 2, 4, 8
    H, E, T = 32, 16, 8

    key = jax.random.PRNGKey(0)
    kp, kd, ko = jax.random.split(key, 3)
    params = init_params(kp, design_shape=D, T=T, hidden_dim=H, embedding_dim=E)

    designs = jax.random.normal(kd, (B, t, D), jnp.float32)
    outcomes = jax.random.bernoulli(ko, 0.5, (B, t, 1)).astype(jnp.float32)

    out = jax.block_until_ready(deep_adaptive_design(designs, outcomes, params))
    ref = reference(designs, outcomes, params)

    assert out.shape == (B, D)
    # kernel uses bf16 weights/matmul inputs with f32 accumulation -> loose tol vs f32 ref
    assert jnp.allclose(out, ref, atol=3e-2, rtol=3e-2), (out, ref)
    print("KERNEL_OK")
</pallas_src>

<mosaic_0001>
module attributes {stable_mosaic.version = 11 : i64} {
  func.func @_dad_kernel(%arg0: i32, %arg1: i32, %arg2: memref<1x2x8xf32, #tpu.memory_space<vmem>>, %arg3: memref<1x2x1xf32, #tpu.memory_space<vmem>>, %arg4: memref<8x16xbf16, #tpu.memory_space<vmem>>, %arg5: memref<3x16x32xbf16, #tpu.memory_space<vmem>>, %arg6: memref<2x32x16xbf16, #tpu.memory_space<vmem>>, %arg7: memref<16x16xbf16, #tpu.memory_space<vmem>>, %arg8: memref<32x8xbf16, #tpu.memory_space<vmem>>, %arg9: memref<6x16xf32, #tpu.memory_space<vmem>>, %arg10: memref<4x32xf32, #tpu.memory_space<vmem>>, %arg11: memref<4x16xf32, #tpu.memory_space<vmem>>, %arg12: memref<3x32xf32, #tpu.memory_space<vmem>>, %arg13: memref<1x8xf32, #tpu.memory_space<vmem>>, %arg14: memref<2x8xf32, #tpu.memory_space<vmem>>, %arg15: memref<2x16xf32, #tpu.memory_space<vmem>>) attributes {dimension_semantics = [#tpu.dimension_semantics<parallel>, #tpu.dimension_semantics<arbitrary>], iteration_bounds = array<i64: 1, 4>, scalar_prefetch = 0 : i64, scratch_operands = 1 : i64, tpu.core_type = #tpu.core_type<tc>, window_params = [{transform_indices = @transform_0, window_bounds = array<i64: 1, 2, 8>}, {transform_indices = @transform_1, window_bounds = array<i64: 1, 2, 1>}, {pipeline_mode = #tpu.pipeline_mode<synchronous>, transform_indices = @transform_2, window_bounds = array<i64: 8, 16>}, {pipeline_mode = #tpu.pipeline_mode<synchronous>, transform_indices = @transform_3, window_bounds = array<i64: 3, 16, 32>}, {pipeline_mode = #tpu.pipeline_mode<synchronous>, transform_indices = @transform_4, window_bounds = array<i64: 2, 32, 16>}, {pipeline_mode = #tpu.pipeline_mode<synchronous>, transform_indices = @transform_5, window_bounds = array<i64: 16, 16>}, {pipeline_mode = #tpu.pipeline_mode<synchronous>, transform_indices = @transform_6, window_bounds = array<i64: 32, 8>}, {pipeline_mode = #tpu.pipeline_mode<synchronous>, transform_indices = @transform_7, window_bounds = array<i64: 6, 16>}, {pipeline_mode = #tpu.pipeline_mode<synchronous>, transform_indices = @transform_8, window_bounds = array<i64: 4, 32>}, {pipeline_mode = #tpu.pipeline_mode<synchronous>, transform_indices = @transform_9, window_bounds = array<i64: 4, 16>}, {pipeline_mode = #tpu.pipeline_mode<synchronous>, transform_indices = @transform_10, window_bounds = array<i64: 3, 32>}, {pipeline_mode = #tpu.pipeline_mode<synchronous>, transform_indices = @transform_11, window_bounds = array<i64: 1, 8>}, {transform_indices = @transform_12, window_bounds = array<i64: 2, 8>}]} {
    %c0_i32 = arith.constant 0 : i32
    %0 = arith.cmpi eq, %arg1, %c0_i32 : i32
    %1 = arith.extui %0 : i1 to i32
    %c0_i32_0 = arith.constant 0 : i32
    %2 = arith.cmpi ne, %1, %c0_i32_0 : i32
    scf.if %2 {
      %cst_71 = arith.constant 0.000000e+00 : f32
      %195 = vector.broadcast %cst_71 : f32 to vector<2x16xf32>
      %c0_72 = arith.constant 0 : index
      %c0_73 = arith.constant 0 : index
      %196 = vector.load %arg15[%c0_72, %c0_73] : memref<2x16xf32, #tpu.memory_space<vmem>>, vector<2x16xf32>
      tpu.vector_store %arg15[%c0_72, %c0_73], %195 {strides = array<i32>} : memref<2x16xf32, #tpu.memory_space<vmem>>, vector<2x16xf32>,
    } else {
    }
    %c0 = arith.constant 0 : index
    %c0_1 = arith.constant 0 : index
    %c0_2 = arith.constant 0 : index
    %3 = vector.load %arg2[%c0, %c0_1, %c0_2] : memref<1x2x8xf32, #tpu.memory_space<vmem>>, vector<1x2x8xf32>
    %4 = vector.shape_cast %3 : vector<1x2x8xf32> to vector<2x8xf32>
    %c0_3 = arith.constant 0 : index
    %c0_4 = arith.constant 0 : index
    %c0_5 = arith.constant 0 : index
    %5 = vector.load %arg3[%c0_3, %c0_4, %c0_5] : memref<1x2x1xf32, #tpu.memory_space<vmem>>, vector<1x2x1xf32>
    %6 = vector.shape_cast %5 : vector<1x2x1xf32> to vector<2x1xf32>
    %c0_6 = arith.constant 0 : index
    %c0_7 = arith.constant 0 : index
    %7 = vector.load %arg9[%c0_6, %c0_7] : memref<6x16xf32, #tpu.memory_space<vmem>>, vector<6x16xf32>
    %c0_8 = arith.constant 0 : index
    %c0_9 = arith.constant 0 : index
    %8 = vector.load %arg10[%c0_8, %c0_9] : memref<4x32xf32, #tpu.memory_space<vmem>>, vector<4x32xf32>
    %c0_10 = arith.constant 0 : index
    %c0_11 = arith.constant 0 : index
    %9 = vector.load %arg11[%c0_10, %c0_11] : memref<4x16xf32, #tpu.memory_space<vmem>>, vector<4x16xf32>
    %c0_12 = arith.constant 0 : index
    %c0_13 = arith.constant 0 : index
    %10 = vector.load %arg12[%c0_12, %c0_13] : memref<3x32xf32, #tpu.memory_space<vmem>>, vector<3x32xf32>
    %c0_14 = arith.constant 0 : index
    %c0_15 = arith.constant 0 : index
    %11 = vector.load %arg4[%c0_14, %c0_15] : memref<8x16xbf16, #tpu.memory_space<vmem>>, vector<8x16xbf16>
    %12 = arith.truncf %4 : vector<2x8xf32> to vector<2x8xbf16>
    %cst = arith.constant dense<0.000000e+00> : vector<2x16xf32>
    %13 = tpu.matmul %12, %11, %cst {dimension_numbers = #tpu.dot_dimension_numbers<[1], [0], [0], [1], [0, 0, 1, 1], [], []>} : vector<2x8xbf16>, vector<8x16xbf16>, vector<2x16xf32> -> vector<2x16xf32>
    %14 = vector.extract_strided_slice %9 {offsets = [0, 0], sizes = [1, 16], strides = [1, 1]} : vector<4x16xf32> to vector<1x16xf32>
    %15 = vector.broadcast %14 : vector<1x16xf32> to vector<2x16xf32>
    %16 = arith.addf %13, %15 : vector<2x16xf32>
    %17 = vector.extract_strided_slice %7 {offsets = [0, 0], sizes = [1, 16], strides = [1, 1]} : vector<6x16xf32> to vector<1x16xf32>
    %18 = vector.extract_strided_slice %7 {offsets = [1, 0], sizes = [1, 16], strides = [1, 1]} : vector<6x16xf32> to vector<1x16xf32>
    %cst_16 = arith.constant dense<0.000000e+00> : vector<2xf32>
    %19 = vector.multi_reduction <add>, %16, %cst_16 [1] : vector<2x16xf32> to vector<2xf32>
    %20 = vector.shape_cast %19 : vector<2xf32> to vector<2x1xf32>
    %21 = arith.mulf %16, %16 : vector<2x16xf32>
    %cst_17 = arith.constant dense<0.000000e+00> : vector<2xf32>
    %22 = vector.multi_reduction <add>, %21, %cst_17 [1] : vector<2x16xf32> to vector<2xf32>
    %23 = vector.shape_cast %22 : vector<2xf32> to vector<2x1xf32>
    %cst_18 = arith.constant 6.250000e-02 : f32
    %24 = vector.broadcast %cst_18 : f32 to vector<2x1xf32>
    %25 = arith.mulf %20, %24 : vector<2x1xf32>
    %cst_19 = arith.constant 6.250000e-02 : f32
    %26 = vector.broadcast %cst_19 : f32 to vector<2x1xf32>
    %27 = arith.mulf %23, %26 : vector<2x1xf32>
    %28 = arith.mulf %25, %25 : vector<2x1xf32>
    %29 = arith.subf %27, %28 : vector<2x1xf32>
    %cst_20 = arith.constant 0.000000e+00 : f32
    %30 = vector.broadcast %cst_20 : f32 to vector<2x1xf32>
    %31 = arith.maximumf %29, %30 : vector<2x1xf32>
    %32 = vector.broadcast %25 : vector<2x1xf32> to vector<2x16xf32>
    %33 = arith.subf %16, %32 : vector<2x16xf32>
    %cst_21 = arith.constant 9.99999974E-6 : f32
    %34 = vector.broadcast %cst_21 : f32 to vector<2x1xf32>
    %35 = arith.addf %31, %34 : vector<2x1xf32>
    %36 = math.rsqrt %35 : vector<2x1xf32>
    %37 = vector.broadcast %36 : vector<2x1xf32> to vector<2x16xf32>
    %38 = arith.mulf %33, %37 : vector<2x16xf32>
    %39 = vector.broadcast %17 : vector<1x16xf32> to vector<2x16xf32>
    %40 = arith.mulf %38, %39 : vector<2x16xf32>
    %41 = vector.broadcast %18 : vector<1x16xf32> to vector<2x16xf32>
    %42 = arith.addf %40, %41 : vector<2x16xf32>
    %cst_22 = arith.constant 0.000000e+00 : f32
    %43 = vector.broadcast %cst_22 : f32 to vector<2x16xf32>
    %44 = arith.maximumf %42, %43 : vector<2x16xf32>
    %c0_23 = arith.constant 0 : index
    %c0_24 = arith.constant 0 : index
    %c0_25 = arith.constant 0 : index
    %45 = vector.load %arg5[%c0_23, %c0_24, %c0_25] : memref<3x16x32xbf16, #tpu.memory_space<vmem>>, vector<1x16x32xbf16>
    %46 = vector.shape_cast %45 : vector<1x16x32xbf16> to vector<16x32xbf16>
    %47 = arith.truncf %44 : vector<2x16xf32> to vector<2x16xbf16>
    %cst_26 = arith.constant dense<0.000000e+00> : vector<2x32xf32>
    %48 = tpu.matmul %47, %46, %cst_26 {dimension_numbers = #tpu.dot_dimension_numbers<[1], [0], [0], [1], [0, 0, 1, 1], [], []>} : vector<2x16xbf16>, vector<16x32xbf16>, vector<2x32xf32> -> vector<2x32xf32>
    %49 = vector.extract_strided_slice %10 {offsets = [0, 0], sizes = [1, 32], strides = [1, 1]} : vector<3x32xf32> to vector<1x32xf32>
    %50 = vector.broadcast %49 : vector<1x32xf32> to vector<2x32xf32>
    %51 = arith.addf %48, %50 : vector<2x32xf32>
    %52 = vector.extract_strided_slice %8 {offsets = [0, 0], sizes = [1, 32], strides = [1, 1]} : vector<4x32xf32> to vector<1x32xf32>
    %53 = vector.extract_strided_slice %8 {offsets = [1, 0], sizes = [1, 32], strides = [1, 1]} : vector<4x32xf32> to vector<1x32xf32>
    %cst_27 = arith.constant dense<0.000000e+00> : vector<2xf32>
    %54 = vector.multi_reduction <add>, %51, %cst_27 [1] : vector<2x32xf32> to vector<2xf32>
    %55 = vector.shape_cast %54 : vector<2xf32> to vector<2x1xf32>
    %56 = arith.mulf %51, %51 : vector<2x32xf32>
    %cst_28 = arith.constant dense<0.000000e+00> : vector<2xf32>
    %57 = vector.multi_reduction <add>, %56, %cst_28 [1] : vector<2x32xf32> to vector<2xf32>
    %58 = vector.shape_cast %57 : vector<2xf32> to vector<2x1xf32>
    %cst_29 = arith.constant 3.125000e-02 : f32
    %59 = vector.broadcast %cst_29 : f32 to vector<2x1xf32>
    %60 = arith.mulf %55, %59 : vector<2x1xf32>
    %cst_30 = arith.constant 3.125000e-02 : f32
    %61 = vector.broadcast %cst_30 : f32 to vector<2x1xf32>
    %62 = arith.mulf %58, %61 : vector<2x1xf32>
    %63 = arith.mulf %60, %60 : vector<2x1xf32>
    %64 = arith.subf %62, %63 : vector<2x1xf32>
    %cst_31 = arith.constant 0.000000e+00 : f32
    %65 = vector.broadcast %cst_31 : f32 to vector<2x1xf32>
    %66 = arith.maximumf %64, %65 : vector<2x1xf32>
    %67 = vector.broadcast %60 : vector<2x1xf32> to vector<2x32xf32>
    %68 = arith.subf %51, %67 : vector<2x32xf32>
    %cst_32 = arith.constant 9.99999974E-6 : f32
    %69 = vector.broadcast %cst_32 : f32 to vector<2x1xf32>
    %70 = arith.addf %66, %69 : vector<2x1xf32>
    %71 = math.rsqrt %70 : vector<2x1xf32>
    %72 = vector.broadcast %71 : vector<2x1xf32> to vector<2x32xf32>
    %73 = arith.mulf %68, %72 : vector<2x32xf32>
    %74 = vector.broadcast %52 : vector<1x32xf32> to vector<2x32xf32>
    %75 = arith.mulf %73, %74 : vector<2x32xf32>
    %76 = vector.broadcast %53 : vector<1x32xf32> to vector<2x32xf32>
    %77 = arith.addf %75, %76 : vector<2x32xf32>
    %cst_33 = arith.constant 0.000000e+00 : f32
    %78 = vector.broadcast %cst_33 : f32 to vector<2x32xf32>
    %79 = arith.maximumf %77, %78 : vector<2x32xf32>
    %c0_34 = arith.constant 0 : index
    %c0_35 = arith.constant 0 : index
    %c0_36 = arith.constant 0 : index
    %80 = vector.load %arg6[%c0_34, %c0_35, %c0_36] : memref<2x32x16xbf16, #tpu.memory_space<vmem>>, vector<1x32x16xbf16>
    %81 = vector.shape_cast %80 : vector<1x32x16xbf16> to vector<32x16xbf16>
    %82 = arith.truncf %79 : vector<2x32xf32> to vector<2x32xbf16>
    %cst_37 = arith.constant dense<0.000000e+00> : vector<2x16xf32>
    %83 = tpu.matmul %82, %81, %cst_37 {dimension_numbers = #tpu.dot_dimension_numbers<[1], [0], [0], [1], [0, 0, 1, 1], [], []>} : vector<2x32xbf16>, vector<32x16xbf16>, vector<2x16xf32> -> vector<2x16xf32>
    %84 = vector.extract_strided_slice %9 {offsets = [1, 0], sizes = [1, 16], strides = [1, 1]} : vector<4x16xf32> to vector<1x16xf32>
    %85 = vector.broadcast %84 : vector<1x16xf32> to vector<2x16xf32>
    %86 = arith.addf %83, %85 : vector<2x16xf32>
    %87 = vector.extract_strided_slice %7 {offsets = [2, 0], sizes = [1, 16], strides = [1, 1]} : vector<6x16xf32> to vector<1x16xf32>
    %88 = vector.extract_strided_slice %7 {offsets = [3, 0], sizes = [1, 16], strides = [1, 1]} : vector<6x16xf32> to vector<1x16xf32>
    %cst_38 = arith.constant dense<0.000000e+00> : vector<2xf32>
    %89 = vector.multi_reduction <add>, %86, %cst_38 [1] : vector<2x16xf32> to vector<2xf32>
    %90 = vector.shape_cast %89 : vector<2xf32> to vector<2x1xf32>
    %91 = arith.mulf %86, %86 : vector<2x16xf32>
    %cst_39 = arith.constant dense<0.000000e+00> : vector<2xf32>
    %92 = vector.multi_reduction <add>, %91, %cst_39 [1] : vector<2x16xf32> to vector<2xf32>
    %93 = vector.shape_cast %92 : vector<2xf32> to vector<2x1xf32>
    %cst_40 = arith.constant 6.250000e-02 : f32
    %94 = vector.broadcast %cst_40 : f32 to vector<2x1xf32>
    %95 = arith.mulf %90, %94 : vector<2x1xf32>
    %cst_41 = arith.constant 6.250000e-02 : f32
    %96 = vector.broadcast %cst_41 : f32 to vector<2x1xf32>
    %97 = arith.mulf %93, %96 : vector<2x1xf32>
    %98 = arith.mulf %95, %95 : vector<2x1xf32>
    %99 = arith.subf %97, %98 : vector<2x1xf32>
    %cst_42 = arith.constant 0.000000e+00 : f32
    %100 = vector.broadcast %cst_42 : f32 to vector<2x1xf32>
    %101 = arith.maximumf %99, %100 : vector<2x1xf32>
    %102 = vector.broadcast %95 : vector<2x1xf32> to vector<2x16xf32>
    %103 = arith.subf %86, %102 : vector<2x16xf32>
    %cst_43 = arith.constant 9.99999974E-6 : f32
    %104 = vector.broadcast %cst_43 : f32 to vector<2x1xf32>
    %105 = arith.addf %101, %104 : vector<2x1xf32>
    %106 = math.rsqrt %105 : vector<2x1xf32>
    %107 = vector.broadcast %106 : vector<2x1xf32> to vector<2x16xf32>
    %108 = arith.mulf %103, %107 : vector<2x16xf32>
    %109 = vector.broadcast %87 : vector<1x16xf32> to vector<2x16xf32>
    %110 = arith.mulf %108, %109 : vector<2x16xf32>
    %111 = vector.broadcast %88 : vector<1x16xf32> to vector<2x16xf32>
    %112 = arith.addf %110, %111 : vector<2x16xf32>
    %cst_44 = arith.constant 0.000000e+00 : f32
    %113 = vector.broadcast %cst_44 : f32 to vector<2x16xf32>
    %114 = arith.maximumf %112, %113 : vector<2x16xf32>
    %c1 = arith.constant 1 : index
    %c0_45 = arith.constant 0 : index
    %c0_46 = arith.constant 0 : index
    %115 = vector.load %arg5[%c1, %c0_45, %c0_46] : memref<3x16x32xbf16, #tpu.memory_space<vmem>>, vector<1x16x32xbf16>
    %116 = vector.shape_cast %115 : vector<1x16x32xbf16> to vector<16x32xbf16>
    %117 = arith.truncf %44 : vector<2x16xf32> to vector<2x16xbf16>
    %cst_47 = arith.constant dense<0.000000e+00> : vector<2x32xf32>
    %118 = tpu.matmul %117, %116, %cst_47 {dimension_numbers = #tpu.dot_dimension_numbers<[1], [0], [0], [1], [0, 0, 1, 1], [], []>} : vector<2x16xbf16>, vector<16x32xbf16>, vector<2x32xf32> -> vector<2x32xf32>
    %119 = vector.extract_strided_slice %10 {offsets = [1, 0], sizes = [1, 32], strides = [1, 1]} : vector<3x32xf32> to vector<1x32xf32>
    %120 = vector.broadcast %119 : vector<1x32xf32> to vector<2x32xf32>
    %121 = arith.addf %118, %120 : vector<2x32xf32>
    %122 = vector.extract_strided_slice %8 {offsets = [2, 0], sizes = [1, 32], strides = [1, 1]} : vector<4x32xf32> to vector<1x32xf32>
    %123 = vector.extract_strided_slice %8 {offsets = [3, 0], sizes = [1, 32], strides = [1, 1]} : vector<4x32xf32> to vector<1x32xf32>
    %cst_48 = arith.constant dense<0.000000e+00> : vector<2xf32>
    %124 = vector.multi_reduction <add>, %121, %cst_48 [1] : vector<2x32xf32> to vector<2xf32>
    %125 = vector.shape_cast %124 : vector<2xf32> to vector<2x1xf32>
    %126 = arith.mulf %121, %121 : vector<2x32xf32>
    %cst_49 = arith.constant dense<0.000000e+00> : vector<2xf32>
    %127 = vector.multi_reduction <add>, %126, %cst_49 [1] : vector<2x32xf32> to vector<2xf32>
    %128 = vector.shape_cast %127 : vector<2xf32> to vector<2x1xf32>
    %cst_50 = arith.constant 3.125000e-02 : f32
    %129 = vector.broadcast %cst_50 : f32 to vector<2x1xf32>
    %130 = arith.mulf %125, %129 : vector<2x1xf32>
    %cst_51 = arith.constant 3.125000e-02 : f32
    %131 = vector.broadcast %cst_51 : f32 to vector<2x1xf32>
    %132 = arith.mulf %128, %131 : vector<2x1xf32>
    %133 = arith.mulf %130, %130 : vector<2x1xf32>
    %134 = arith.subf %132, %133 : vector<2x1xf32>
    %cst_52 = arith.constant 0.000000e+00 : f32
    %135 = vector.broadcast %cst_52 : f32 to vector<2x1xf32>
    %136 = arith.maximumf %134, %135 : vector<2x1xf32>
    %137 = vector.broadcast %130 : vector<2x1xf32> to vector<2x32xf32>
    %138 = arith.subf %121, %137 : vector<2x32xf32>
    %cst_53 = arith.constant 9.99999974E-6 : f32
    %139 = vector.broadcast %cst_53 : f32 to vector<2x1xf32>
    %140 = arith.addf %136, %139 : vector<2x1xf32>
    %141 = math.rsqrt %140 : vector<2x1xf32>
    %142 = vector.broadcast %141 : vector<2x1xf32> to vector<2x32xf32>
    %143 = arith.mulf %138, %142 : vector<2x32xf32>
    %144 = vector.broadcast %122 : vector<1x32xf32> to vector<2x32xf32>
    %145 = arith.mulf %143, %144 : vector<2x32xf32>
    %146 = vector.broadcast %123 : vector<1x32xf32> to vector<2x32xf32>
    %147 = arith.addf %145, %146 : vector<2x32xf32>
    %cst_54 = arith.constant 0.000000e+00 : f32
    %148 = vector.broadcast %cst_54 : f32 to vector<2x32xf32>
    %149 = arith.maximumf %147, %148 : vector<2x32xf32>
    %c1_55 = arith.constant 1 : index
    %c0_56 = arith.constant 0 : index
    %c0_57 = arith.constant 0 : index
    %150 = vector.load %arg6[%c1_55, %c0_56, %c0_57] : memref<2x32x16xbf16, #tpu.memory_space<vmem>>, vector<1x32x16xbf16>
    %151 = vector.shape_cast %150 : vector<1x32x16xbf16> to vector<32x16xbf16>
    %152 = arith.truncf %149 : vector<2x32xf32> to vector<2x32xbf16>
    %cst_58 = arith.constant dense<0.000000e+00> : vector<2x16xf32>
    %153 = tpu.matmul %152, %151, %cst_58 {dimension_numbers = #tpu.dot_dimension_numbers<[1], [0], [0], [1], [0, 0, 1, 1], [], []>} : vector<2x32xbf16>, vector<32x16xbf16>, vector<2x16xf32> -> vector<2x16xf32>
    %154 = vector.extract_strided_slice %9 {offsets = [2, 0], sizes = [1, 16], strides = [1, 1]} : vector<4x16xf32> to vector<1x16xf32>
    %155 = vector.broadcast %154 : vector<1x16xf32> to vector<2x16xf32>
    %156 = arith.addf %153, %155 : vector<2x16xf32>
    %157 = vector.extract_strided_slice %7 {offsets = [4, 0], sizes = [1, 16], strides = [1, 1]} : vector<6x16xf32> to vector<1x16xf32>
    %158 = vector.extract_strided_slice %7 {offsets = [5, 0], sizes = [1, 16], strides = [1, 1]} : vector<6x16xf32> to vector<1x16xf32>
    %cst_59 = arith.constant dense<0.000000e+00> : vector<2xf32>
    %159 = vector.multi_reduction <add>, %156, %cst_59 [1] : vector<2x16xf32> to vector<2xf32>
    %160 = vector.shape_cast %159 : vector<2xf32> to vector<2x1xf32>
    %161 = arith.mulf %156, %156 : vector<2x16xf32>
    %cst_60 = arith.constant dense<0.000000e+00> : vector<2xf32>
    %162 = vector.multi_reduction <add>, %161, %cst_60 [1] : vector<2x16xf32> to vector<2xf32>
    %163 = vector.shape_cast %162 : vector<2xf32> to vector<2x1xf32>
    %cst_61 = arith.constant 6.250000e-02 : f32
    %164 = vector.broadcast %cst_61 : f32 to vector<2x1xf32>
    %165 = arith.mulf %160, %164 : vector<2x1xf32>
    %cst_62 = arith.constant 6.250000e-02 : f32
    %166 = vector.broadcast %cst_62 : f32 to vector<2x1xf32>
    %167 = arith.mulf %163, %166 : vector<2x1xf32>
    %168 = arith.mulf %165, %165 : vector<2x1xf32>
    %169 = arith.subf %167, %168 : vector<2x1xf32>
    %cst_63 = arith.constant 0.000000e+00 : f32
    %170 = vector.broadcast %cst_63 : f32 to vector<2x1xf32>
    %171 = arith.maximumf %169, %170 : vector<2x1xf32>
    %172 = vector.broadcast %165 : vector<2x1xf32> to vector<2x16xf32>
    %173 = arith.subf %156, %172 : vector<2x16xf32>
    %cst_64 = arith.constant 9.99999974E-6 : f32
    %174 = vector.broadcast %cst_64 : f32 to vector<2x1xf32>
    %175 = arith.addf %171, %174 : vector<2x1xf32>
    %176 = math.rsqrt %175 : vector<2x1xf32>
    %177 = vector.broadcast %176 : vector<2x1xf32> to vector<2x16xf32>
    %178 = arith.mulf %173, %177 : vector<2x16xf32>
    %179 = vector.broadcast %157 : vector<1x16xf32> to vector<2x16xf32>
    %180 = arith.mulf %178, %179 : vector<2x16xf32>
    %181 = vector.broadcast %158 : vector<1x16xf32> to vector<2x16xf32>
    %182 = arith.addf %180, %181 : vector<2x16xf32>
    %cst_65 = arith.constant 0.000000e+00 : f32
    %183 = vector.broadcast %cst_65 : f32 to vector<2x16xf32>
    %184 = arith.maximumf %182, %183 : vector<2x16xf32>
    %c0_66 = arith.constant 0 : index
    %c0_67 = arith.constant 0 : index
    %185 = vector.load %arg15[%c0_66, %c0_67] : memref<2x16xf32, #tpu.memory_space<vmem>>, vector<2x16xf32>
    %186 = arith.subf %184, %114 : vector<2x16xf32>
    %187 = vector.broadcast %6 : vector<2x1xf32> to vector<2x16xf32>
    %188 = arith.mulf %187, %186 : vector<2x16xf32>
    %189 = arith.addf %114, %188 : vector<2x16xf32>
    %190 = arith.addf %185, %189 : vector<2x16xf32>
    %c0_68 = arith.constant 0 : index
    %c0_69 = arith.constant 0 : index
    %191 = vector.load %arg15[%c0_68, %c0_69] : memref<2x16xf32, #tpu.memory_space<vmem>>, vector<2x16xf32>
    tpu.vector_store %arg15[%c0_68, %c0_69], %190 {strides = array<i32>} : memref<2x16xf32, #tpu.memory_space<vmem>>, vector<2x16xf32>,
    %c3_i32 = arith.constant 3 : i32
    %192 = arith.cmpi eq, %arg1, %c3_i32 : i32
    %193 = arith.extui %192 : i1 to i32
    %c0_i32_70 = arith.constant 0 : i32
    %194 = arith.cmpi ne, %193, %c0_i32_70 : i32
    scf.if %194 {
      %c0_71 = arith.constant 0 : index
      %c0_72 = arith.constant 0 : index
      %195 = vector.load %arg15[%c0_71, %c0_72] : memref<2x16xf32, #tpu.memory_space<vmem>>, vector<2x16xf32>
      %c0_73 = arith.constant 0 : index
      %c0_74 = arith.constant 0 : index
      %196 = vector.load %arg7[%c0_73, %c0_74] : memref<16x16xbf16, #tpu.memory_space<vmem>>, vector<16x16xbf16>
      %197 = arith.truncf %195 : vector<2x16xf32> to vector<2x16xbf16>
      %cst_75 = arith.constant dense<0.000000e+00> : vector<2x16xf32>
      %198 = tpu.matmul %197, %196, %cst_75 {dimension_numbers = #tpu.dot_dimension_numbers<[1], [0], [0], [1], [0, 0, 1, 1], [], []>} : vector<2x16xbf16>, vector<16x16xbf16>, vector<2x16xf32> -> vector<2x16xf32>
      %199 = vector.extract_strided_slice %9 {offsets = [3, 0], sizes = [1, 16], strides = [1, 1]} : vector<4x16xf32> to vector<1x16xf32>
      %200 = vector.broadcast %199 : vector<1x16xf32> to vector<2x16xf32>
      %201 = arith.addf %198, %200 : vector<2x16xf32>
      %c2 = arith.constant 2 : index
      %c0_76 = arith.constant 0 : index
      %c0_77 = arith.constant 0 : index
      %202 = vector.load %arg5[%c2, %c0_76, %c0_77] : memref<3x16x32xbf16, #tpu.memory_space<vmem>>, vector<1x16x32xbf16>
      %203 = vector.shape_cast %202 : vector<1x16x32xbf16> to vector<16x32xbf16>
      %204 = arith.truncf %201 : vector<2x16xf32> to vector<2x16xbf16>
      %cst_78 = arith.constant dense<0.000000e+00> : vector<2x32xf32>
      %205 = tpu.matmul %204, %203, %cst_78 {dimension_numbers = #tpu.dot_dimension_numbers<[1], [0], [0], [1], [0, 0, 1, 1], [], []>} : vector<2x16xbf16>, vector<16x32xbf16>, vector<2x32xf32> -> vector<2x32xf32>
      %206 = vector.extract_strided_slice %10 {offsets = [2, 0], sizes = [1, 32], strides = [1, 1]} : vector<3x32xf32> to vector<1x32xf32>
      %207 = vector.broadcast %206 : vector<1x32xf32> to vector<2x32xf32>
      %208 = arith.addf %205, %207 : vector<2x32xf32>
      %cst_79 = arith.constant 0.000000e+00 : f32
      %209 = vector.broadcast %cst_79 : f32 to vector<2x32xf32>
      %210 = arith.maximumf %208, %209 : vector<2x32xf32>
      %c0_80 = arith.constant 0 : index
      %c0_81 = arith.constant 0 : index
      %211 = vector.load %arg8[%c0_80, %c0_81] : memref<32x8xbf16, #tpu.memory_space<vmem>>, vector<32x8xbf16>
      %212 = arith.truncf %210 : vector<2x32xf32> to vector<2x32xbf16>
      %cst_82 = arith.constant dense<0.000000e+00> : vector<2x8xf32>
      %213 = tpu.matmul %212, %211, %cst_82 {dimension_numbers = #tpu.dot_dimension_numbers<[1], [0], [0], [1], [0, 0, 1, 1], [], []>} : vector<2x32xbf16>, vector<32x8xbf16>, vector<2x8xf32> -> vector<2x8xf32>
      %c0_83 = arith.constant 0 : index
      %c0_84 = arith.constant 0 : index
      %214 = vector.load %arg13[%c0_83, %c0_84] : memref<1x8xf32, #tpu.memory_space<vmem>>, vector<1x8xf32>
      %215 = vector.broadcast %214 : vector<1x8xf32> to vector<2x8xf32>
      %216 = arith.addf %213, %215 : vector<2x8xf32>
      %c0_85 = arith.constant 0 : index
      %c0_86 = arith.constant 0 : index
      %217 = vector.load %arg14[%c0_85, %c0_86] : memref<2x8xf32, #tpu.memory_space<vmem>>, vector<2x8xf32>
      tpu.vector_store %arg14[%c0_85, %c0_86], %216 {strides = array<i32>} : memref<2x8xf32, #tpu.memory_space<vmem>>, vector<2x8xf32>,
    } else {
    }
    return
  }
  func.func @transform_0(%arg0: i32, %arg1: i32) -> (i32, i32, i32) {
    %c0_i32 = arith.constant 0 : i32
    %c0_i32_0 = arith.constant 0 : i32
    return %arg1, %arg0, %c0_i32 : i32, i32, i32
  }
  func.func @transform_1(%arg0: i32, %arg1: i32) -> (i32, i32, i32) {
    %c0_i32 = arith.constant 0 : i32
    %c0_i32_0 = arith.constant 0 : i32
    return %arg1, %arg0, %c0_i32 : i32, i32, i32
  }
  func.func @transform_2(%arg0: i32, %arg1: i32) -> (i32, i32) {
    %c0_i32 = arith.constant 0 : i32
    %c0_i32_0 = arith.constant 0 : i32
    %c0_i32_1 = arith.constant 0 : i32
    return %c0_i32, %c0_i32_0 : i32, i32
  }
  func.func @transform_3(%arg0: i32, %arg1: i32) -> (i32, i32, i32) {
    %c0_i32 = arith.constant 0 : i32
    %c0_i32_0 = arith.constant 0 : i32
    %c0_i32_1 = arith.constant 0 : i32
    %c0_i32_2 = arith.constant 0 : i32
    return %c0_i32, %c0_i32_0, %c0_i32_1 : i32, i32, i32
  }
  func.func @transform_4(%arg0: i32, %arg1: i32) -> (i32, i32, i32) {
    %c0_i32 = arith.constant 0 : i32
    %c0_i32_0 = arith.constant 0 : i32
    %c0_i32_1 = arith.constant 0 : i32
    %c0_i32_2 = arith.constant 0 : i32
    return %c0_i32, %c0_i32_0, %c0_i32_1 : i32, i32, i32
  }
  func.func @transform_5(%arg0: i32, %arg1: i32) -> (i32, i32) {
    %c0_i32 = arith.constant 0 : i32
    %c0_i32_0 = arith.constant 0 : i32
    %c0_i32_1 = arith.constant 0 : i32
    return %c0_i32, %c0_i32_0 : i32, i32
  }
  func.func @transform_6(%arg0: i32, %arg1: i32) -> (i32, i32) {
    %c0_i32 = arith.constant 0 : i32
    %c0_i32_0 = arith.constant 0 : i32
    %c0_i32_1 = arith.constant 0 : i32
    return %c0_i32, %c0_i32_0 : i32, i32
  }
  func.func @transform_7(%arg0: i32, %arg1: i32) -> (i32, i32) {
    %c0_i32 = arith.constant 0 : i32
    %c0_i32_0 = arith.constant 0 : i32
    %c0_i32_1 = arith.constant 0 : i32
    return %c0_i32, %c0_i32_0 : i32, i32
  }
  func.func @transform_8(%arg0: i32, %arg1: i32) -> (i32, i32) {
    %c0_i32 = arith.constant 0 : i32
    %c0_i32_0 = arith.constant 0 : i32
    %c0_i32_1 = arith.constant 0 : i32
    return %c0_i32, %c0_i32_0 : i32, i32
  }
  func.func @transform_9(%arg0: i32, %arg1: i32) -> (i32, i32) {
    %c0_i32 = arith.constant 0 : i32
    %c0_i32_0 = arith.constant 0 : i32
    %c0_i32_1 = arith.constant 0 : i32
    return %c0_i32, %c0_i32_0 : i32, i32
  }
  func.func @transform_10(%arg0: i32, %arg1: i32) -> (i32, i32) {
    %c0_i32 = arith.constant 0 : i32
    %c0_i32_0 = arith.constant 0 : i32
    %c0_i32_1 = arith.constant 0 : i32
    return %c0_i32, %c0_i32_0 : i32, i32
  }
  func.func @transform_11(%arg0: i32, %arg1: i32) -> (i32, i32) {
    %c0_i32 = arith.constant 0 : i32
    %c0_i32_0 = arith.constant 0 : i32
    %c0_i32_1 = arith.constant 0 : i32
    return %c0_i32, %c0_i32_0 : i32, i32
  }
  func.func @transform_12(%arg0: i32, %arg1: i32) -> (i32, i32) {
    %c0_i32 = arith.constant 0 : i32
    %c0_i32_0 = arith.constant 0 : i32
    return %arg0, %c0_i32 : i32, i32
  }
}

</mosaic_0001>

<bundles_post_ra>
// kernel: tpu_custom_call.1
= control target key start
LH: loop header
LB: loop body
LE: loop exit
PB: predicated region body
PF: predicated region fallthrough
CT: control target
= control target key end

     0   :  { %17 = vsyncpa [#allocation4], 0  ;;  %s1469_s21 = smov 0   ;;  %s1471_s22 = smov 0   ;;  %s1673_s0 = inlined_call_operand.vmem [shape: f32[4,2,8], index: 0, kind: input, shape index: {}]   ;;  %s1674_s1 = inlined_call_operand.vmem [shape: f32[4,2,1], index: 1, kind: input, shape index: {}]   ;;  %s1675_s2 = inlined_call_operand.vmem [shape: bf16[8,16], index: 2, kind: input, shape index: {}]   ;;  %s1676_s3 = inlined_call_operand.vmem [shape: bf16[3,16,32], index: 3, kind: input, shape index: {}]   ;;  %s1677_s4 = inlined_call_operand.vmem [shape: bf16[2,32,16], index: 4, kind: input, shape index: {}]   ;;  %s1678_s5 = inlined_call_operand.vmem [shape: bf16[16,16], index: 5, kind: input, shape index: {}]   ;;  %s1679_s6 = inlined_call_operand.vmem [shape: bf16[32,8], index: 6, kind: input, shape index: {}]   ;;  %s1680_s7 = inlined_call_operand.vmem [shape: f32[6,16], index: 7, kind: input, shape index: {}]   ;;  %s1681_s8 = inlined_call_operand.vmem [shape: f32[4,32], index: 8, kind: input, shape index: {}]   ;;  %s1682_s9 = inlined_call_operand.vmem [shape: f32[4,16], index: 9, kind: input, shape index: {}]   ;;  %s1683_s10 = inlined_call_operand.vmem [shape: f32[3,32], index: 10, kind: input, shape index: {}]   ;;  %s1684_s11 = inlined_call_operand.vmem [shape: f32[1,8], index: 11, kind: input, shape index: {}]   ;;  %s1685_s12 = inlined_call_operand.hbm [shape: f32[2,8], index: 12, kind: output, shape index: {}]  }
   0x1   :  { %s1473_s23 = smov 0  }
   0x2 LB: > { %s1173_s24 = sadd.s32 4294967295, %s1395_s23   ;;  %s32_s25 = sadd.s32 1, %s1391_s22  ;;  %s1395_s23 = sphi %s1473_s23, %s23_s23   ;;  %s1391_s22 = sphi %s1471_s22, %s1688_s22   ;;  %s1387_s21 = sphi %s1469_s21, %s1687_s21  }
   0x3   : > { %p33_p0 = scmp.ge.s32.totalorder %s32_s25, 4  ;;  %p1176_p1 = scmp.ge.s32.totalorder %s1395_s23, 1 }
   0x4   : > { %p393_p2 = scmp.lt.s32.totalorder %s1395_s23, 5 }
   0x5   : > { %s1690_s25 = smov (%p33_p0, %s32_s25), 0 }
   0x6   : > { %p394_p3 = pnand %p1176_p1, %p393_p2 }
   0x7   : > { %p439_p4 = scmp.lt.s32.totalorder (!%p394_p3), %s1387_s21, 3  ;;  %p1179_p5 = scmp.ne.s32.totalorder (!%p394_p3), %s1387_s21, 0 }
   0x8   : > { %397 = sbr.rel (%p394_p3) target bundleno = 1896 (0x768), region = 68 }
   0xf   : > { %s440_s26 = scalar_select %p439_p4, %s1387_s21, 3 }
  0x10   : > { %457 = sbr.rel (%p1179_p5) target bundleno = 23 (0x17), region = 72  ;;  %vm458_vm0 = vcmask (!%p1179_p5), 123904   ;;  %v1397_v0 = vmov (!%p1179_p5), 0.0  }
  0x11   : > { %s1177_s27 = sshll.u32 %s440_s26, 1  ;;  %459 = vst.msk [vmem:[#allocation2] sm:$0x3] (!%p1179_p5), %vm458_vm0, %v1397_v0 }
  0x12   : > { %s445_s30 = scalar_lea.vmem %s1673_s0, %s1177_s27  ;;  %s1498_s15 = scalar_lea.vmem %s1674_s1, %s1177_s27 }
  0x17 PF: > { %v466_v1 = vld [vmem:[%s1675_s2] sm:$0xf]  ;;  %vm476_vm1 = vcmask 1043456   ;;  %v1398_v2 = vmov 0.0   ;;  %vm1399_vm2 = vmmov 0   ;;  %vm472_vm3 = vcmask 64512  }
  0x18   : > { %1231 = vmatprep.subr.bf16.mxu0 %v1398_v2  ;;  %v478_v3 = vsel %vm476_vm1, %v466_v1, 0  ;;  %1233 = vmatprep.mubr.msk.bf16.mxu0 %vm1399_vm2, %v1398_v2  ;;  %v460_v4 = vld [vmem:[%s445_s30] sm:$0x3]  ;;  %v468_v6 = vlaneseq  ;;  %vm520_vm4 = vcmask 123904   ;;  %vm561_vm5 = vcmask 130048   ;;  %v1324_v38 = vld [vmem:[%s1676_s3 + $0x8] sm:$0xff]  }
  0x19   : > { %1232 = vmatpush3.bf16.msra.mxu0 %v478_v3  ;;  %v467_v5 = vpack.c.bf16 %v460_v4, %v460_v4  ;;  %1237 = vmatprep.subr.bf16.mxu1 %v1398_v2  ;;  %v1521_v9 = vld [vmem:[%s1682_s9] sm:$0xf]  ;;  %vm605_vm6 = vcmask 254976   ;;  %v1326_v60 = vld [vmem:[%s1677_s4 + $0x8] sm:$0xff]   ;;  %vm654_vm7 = vcmask 261120   ;;  %p1197_p6 = scmp.ne.s32.totalorder %s1387_s21, 3 }
  0x1a   : > { %1239 = vmatprep.mubr.msk.bf16.mxu1 %vm1399_vm2, %v1398_v2  ;;  %1243 = vmatprep.subr.bf16.mxu0 %v1398_v2  ;;  %v1513_v7 = vshrl.u32 %v468_v6, 7  ;;  %v1323_v19 = vld [vmem:[%s1676_s3] sm:$0xff]   ;;  %vm1402_vm8 = vmmov (!%p1197_p6), 0   ;;  %vm1094_vm9 = vcmask (!%p1197_p6), 58368  }
  0x1b   : > { %1238 = vmatpush3.bf16.msra.mxu1 %v1323_v19  ;;  %v1534_v28 = vld [vmem:[%s1680_s7] sm:$0x3f] }
  0x1c   : > { %1234 = vmatmul.mubr.msk.bf16.vlgmr.msra.gmra.mrb[0].mxu0 %vm472_vm3, %v467_v5  ;;  %v1516_v8 = vsub.s32 0, %v1513_v7  ;;  %1251 = vmatprep.subr.bf16.mxu1 %v1398_v2  ;;  %v1537_v29 = vsub.s32 1, %v1513_v7  ;;  %v1553_v40 = vld [vmem:[%s1683_s10] sm:$0x7] }
  0x1d   : > { %1247 = vmatprep.mubr.msk.bf16.mxu0 %vm1399_vm2, %v1398_v2  ;;  %v1325_v59 = vld [vmem:[%s1677_s4] sm:$0xff]  }
  0x1e   : > { %v471_v10 = vrot.slane %v1521_v9, %v1516_v8  ;;  %v540_v31 = vrot.slane %v1534_v28, %v1516_v8  ;;  %v545_v34 = vrot.slane %v1534_v28, %v1537_v29  ;;  %v554_v41 = vrot.slane %v1553_v40, %v1516_v8  ;;  %1244 = vmatpush3.bf16.msra.mxu0 %v1325_v59  ;;  %v461_v59 = vld [vmem:[%s1498_s15] sm:$0x3] }
  0x1f   : > { %v731_v49 = vrot.slane %v1553_v40, %v1537_v29  ;;  %1245 = vmatprep.subr.bf16.mxu0 %v1398_v2 }
  0x22   : > { %1246 = vmatpush3.bf16.msra.mxu0 %v1326_v60 }
  0x23   : > { %1257 = vmatprep.subr.bf16.mxu0 %v1398_v2 }
  0xef   : > { %v514_v11 = vpop.f32.mrb[0].mxu0 }
  0xf0   : > { %v515_v12 = vadd.f32 %v514_v11, %v471_v10  ;;  %v1235_v13 = vpop.f32.mrb[1].mxu0 }
  0xf1   : > { %v517_v14 = vpop.f32.mrb[2].mxu0 }
  0xf2   : > { %v1236_v15 = vpop.f32.mrb[3].mxu0  ;;  %v521_v16 = vsel %vm520_vm4, %v515_v12, 0.0  ;;  %v524_v17 = vmul.f32 %v515_v12, %v515_v12 }
  0xf3   : > { %522 = vadd.xlane.f32.xlu0 %v521_v16 }
  0xf4   : > { %v525_v18 = vsel %vm520_vm4, %v524_v17, 0.0  ;;  %v463_v17 = vld [vmem:[%s1681_s8] sm:$0xf] }
  0xf5   : > { %v625_v19 = vrot.slane %v463_v17, %v1516_v8 }
  0xf7   : > { %526 = vadd.xlane.f32.xlu0 %v525_v18 }
 0x180   : > { %v523_v20 = vpop.xlane.xlu0 %522 }
 0x181   : > { %v528_v21 = vmul.f32 0.0625, %v523_v20 }
 0x183   : > { %v530_v23 = vmul.f32 %v528_v21, %v528_v21  ;;  %v533_v30 = vsub.f32 %v515_v12, %v528_v21 }
 0x184   : > { %v527_v22 = vpop.xlane.xlu0 %526 }
 0x185   : > { %v529_v24 = vmul.f32 0.0625, %v527_v22  ;;  %v630_v22 = vrot.slane %v463_v17, %v1537_v29 }
 0x187   : > { %v531_v25 = vsub.f32 %v529_v24, %v530_v23  ;;  %v1577_v23 = vsub.s32 2, %v1513_v7 }
 0x189   : > { %v532_v26 = vmax.f32 %v531_v25, 0.0  ;;  %v1580_v25 = vsub.s32 3, %v1513_v7 }
 0x18b   : > { %v534_v27 = vadd.f32 1e-05, %v532_v26  ;;  %v802_v8 = vrot.slane %v463_v17, %v1580_v25 }
 0x18d   : > { %1329 = vrsqrt.f32 %v534_v27 }
 0x197   : > { %v1330_v32 = vpop.eup %1329 }
 0x198   : > { %v536_v33 = vmul.f32 %v1330_v32, %v533_v30  ;;  %v797_v30 = vrot.slane %v463_v17, %v1577_v23 }
 0x19a   : > { %v541_v35 = vmul.f32 %v540_v31, %v536_v33 }
 0x19c   : > { %v546_v36 = vadd.f32 %v545_v34, %v541_v35  ;;  %v1327_v34 = vld [vmem:[%s1677_s4 + $0x10] sm:$0xff]  }
 0x19e   : > { %v547_v37 = vmax.f32 %v546_v36, 0.0 }
 0x1a0   : > { %v550_v39 = vpack.c.bf16 %v547_v37, %v547_v37 }
 0x1a2   : > { %1240 = vmatmul.mubr.msk.bf16.vlgmr.msra.gmra.mrb[0].mxu1 %vm561_vm5, %v550_v39 }
 0x1a3   : > { %1252 = vmatpush3.bf16.msra.mxu1 %v1324_v38  ;;  %1253 = vmatprep.mubr.msk.bf16.mxu1 %vm1399_vm2, %v1398_v2  ;;  %v1328_v38 = vld [vmem:[%s1677_s4 + $0x18] sm:$0xff]  }
 0x1aa   : > { %1254 = vmatmul.mubr.msk.bf16.vlgmr.msra.gmra.mrb[4].mxu1 %vm561_vm5, %v550_v39 }
 0x275   : > { %v599_v42 = vpop.f32.mrb[0].mxu1 }
 0x276   : > { %v600_v43 = vadd.f32 %v599_v42, %v554_v41  ;;  %v1241_v44 = vpop.f32.mrb[1].mxu1  ;;  %v1400_v42 = vmov 0  }
 0x277   : > { %v602_v45 = vpop.f32.mrb[2].mxu1  ;;  %1322 = vset.pattern.permute.xlu0 %v1400_v42 }
 0x278   : > { %v1242_v46 = vpop.f32.mrb[3].mxu1  ;;  %v606_v47 = vsel %vm605_vm6, %v600_v43, 0.0  ;;  %v609_v48 = vmul.f32 %v600_v43, %v600_v43 }
 0x279   : > { %607 = vadd.xlane.f32.xlu1 %v606_v47 }
 0x27a   : > { %v610_v50 = vsel %vm605_vm6, %v609_v48, 0.0 }
 0x27d   : > { %611 = vadd.xlane.f32.xlu1 %v610_v50  ;;  %v772_v51 = vpop.f32.mrb[4].mxu1 }
 0x27e   : > { %v773_v52 = vadd.f32 %v772_v51, %v731_v49  ;;  %v1255_v53 = vpop.f32.mrb[5].mxu1 }
 0x27f   : > { %v775_v54 = vpop.f32.mrb[6].mxu1 }
 0x280   : > { %v1256_v55 = vpop.f32.mrb[7].mxu1  ;;  %v778_v56 = vsel %vm605_vm6, %v773_v52, 0.0  ;;  %v781_v57 = vmul.f32 %v773_v52, %v773_v52 }
 0x281   : > { %779 = vadd.xlane.f32.xlu0 %v778_v56 }
 0x282   : > { %v782_v58 = vsel %vm605_vm6, %v781_v57, 0.0 }
 0x283   : > { %783 = vadd.xlane.f32.xlu1 %v782_v58 }
 0x306   : > { %v608_v61 = vpop.xlane.xlu1 %607 }
 0x307   : > { %v613_v62 = vmul.f32 0.03125, %v608_v61 }
 0x309   : > { %v615_v0 = vmul.f32 %v613_v62, %v613_v62  ;;  %v618_v18 = vsub.f32 %v600_v43, %v613_v62  ;;  %v641_v43 = vrot.slane %v1521_v9, %v1537_v29 }
 0x30a   : > { %v612_v63 = vpop.xlane.xlu1 %611 }
 0x30b   : > { %v614_v1 = vmul.f32 0.03125, %v612_v63 }
 0x30d   : > { %v616_v3 = vsub.f32 %v614_v1, %v615_v0 }
 0x30e   : > { %v780_v4 = vpop.xlane.xlu0 %779 }
 0x30f   : > { %v617_v5 = vmax.f32 %v616_v3, 0.0  ;;  %v785_v6 = vmul.f32 0.03125, %v780_v4 }
 0x310   : > { %v784_v10 = vpop.xlane.xlu1 %783 }
 0x311   : > { %v619_v11 = vadd.f32 1e-05, %v617_v5  ;;  %v787_v12 = vmul.f32 %v785_v6, %v785_v6  ;;  %v786_v13 = vmul.f32 0.03125, %v784_v10  ;;  %v790_v26 = vsub.f32 %v773_v52, %v785_v6 }
 0x313   : > { %1331 = vrsqrt.f32 %v619_v11  ;;  %v788_v14 = vsub.f32 %v786_v13, %v787_v12 }
 0x315   : > { %v789_v15 = vmax.f32 %v788_v14, 0.0 }
 0x317   : > { %v791_v16 = vadd.f32 1e-05, %v789_v15 }
 0x319   : > { %1333 = vrsqrt.f32 %v791_v16 }
 0x31d   : > { %v1332_v20 = vpop.eup %1331 }
 0x31e   : > { %v621_v21 = vmul.f32 %v1332_v20, %v618_v18  ;;  %v888_v20 = vsub.s32 4, %v1513_v7 }
 0x320   : > { %v626_v24 = vmul.f32 %v625_v19, %v621_v21  ;;  %v717_v19 = vrot.slane %v1534_v28, %v1577_v23  ;;  %v893_v21 = vsub.s32 5, %v1513_v7  ;;  %v897_v7 = vld [vmem:[#allocation2] sm:$0x3] }
 0x322   : > { %v631_v27 = vadd.f32 %v630_v22, %v626_v24 }
 0x323   : > { %v1334_v31 = vpop.eup %1333 }
 0x324   : > { %v793_v32 = vmul.f32 %v1334_v31, %v790_v26  ;;  %v632_v33 = vmax.f32 %v631_v27, 0.0  ;;  %v722_v26 = vrot.slane %v1534_v28, %v1580_v25  ;;  %v889_v27 = vrot.slane %v1534_v28, %v888_v20 }
 0x325   : > { %v894_v31 = vrot.slane %v1534_v28, %v893_v21  ;;  %v1339_v28 = vld [vmem:[%s1678_s5] sm:$0xff] (!%p1197_p6)  }
 0x326   : > { %v637_v35 = vpack.c.bf16 %v632_v33, %v632_v33  ;;  %v798_v36 = vmul.f32 %v797_v30, %v793_v32 }
 0x328   : > { %1248 = vmatmul.mubr.msk.bf16.vlgmr.msra.gmra.mrb[4].mxu0 %vm654_vm7, %v637_v35  ;;  %v803_v37 = vadd.f32 %v802_v8, %v798_v36 }
 0x329   : > { %1258 = vmatpush3.bf16.msra.mxu0 %v1327_v34  ;;  %1261 = vmatprep.mubr.msk.bf16.mxu0 %vm1399_vm2, %v1398_v2 }
 0x32a   : > { %1259 = vmatprep.subr.bf16.mxu0 %v1398_v2  ;;  %v804_v39 = vmax.f32 %v803_v37, 0.0  ;;  %v814_v2 = vrot.slane %v1521_v9, %v1577_v23 }
 0x32c   : > { %v810_v41 = vpack.c.bf16 %v804_v39, %v804_v39 }
 0x32d   : > { %1260 = vmatpush3.bf16.msra.mxu0 %v1328_v38 }
 0x330   : > { %1262 = vmatmul.mubr.msk.bf16.vlgmr.msra.gmra.mrb[8].mxu0 %vm654_vm7, %v810_v41 }
 0x3fb   : > { %v692_v44 = vpop.f32.mrb[4].mxu0 }
 0x3fc   : > { %v693_v45 = vadd.f32 %v692_v44, %v641_v43  ;;  %v1249_v46 = vpop.f32.mrb[5].mxu0  ;;  %v1401_v43 = vmov (!%p1197_p6), 0.0  }
 0x3fd   : > { %v695_v47 = vpop.f32.mrb[6].mxu0  ;;  %1265 = vmatprep.subr.bf16.mxu0 (!%p1197_p6), %v1401_v43  ;;  %1271 = vmatprep.subr.bf16.mxu1 (!%p1197_p6), %v1401_v43  ;;  %v1340_v46 = vld [vmem:[%s1676_s3 + $0x10] sm:$0xff] (!%p1197_p6)  }
 0x3fe   : > { %v1250_v48 = vpop.f32.mrb[7].mxu0  ;;  %v698_v49 = vsel %vm520_vm4, %v693_v45, 0.0  ;;  %v701_v50 = vmul.f32 %v693_v45, %v693_v45  ;;  %1266 = vmatpush3.bf16.msra.mxu0 (!%p1197_p6), %v1339_v28  ;;  %1267 = vmatprep.mubr.msk.bf16.mxu0 (!%p1197_p6), %vm1402_vm8, %v1401_v43  ;;  %v1341_v47 = vld [vmem:[%s1679_s6] sm:$0xff] (!%p1197_p6)  }
 0x3ff   : > { %699 = vadd.xlane.f32.xlu0 %v698_v49  ;;  %1273 = vmatprep.mubr.msk.bf16.mxu1 (!%p1197_p6), %vm1402_vm8, %v1401_v43  ;;  %v919_v48 = vrot.slane (!%p1197_p6), %v1521_v9, %v1580_v25 }
 0x400   : > { %v702_v51 = vsel %vm520_vm4, %v701_v50, 0.0  ;;  %1277 = vmatprep.subr.bf16.mxu0 (!%p1197_p6), %v1401_v43  ;;  %1272 = vmatpush3.bf16.msra.mxu1 (!%p1197_p6), %v1340_v46 }
 0x403   : > { %703 = vadd.xlane.f32.xlu0 %v702_v51  ;;  %v864_v52 = vpop.f32.mrb[8].mxu0 }
 0x404   : > { %v865_v53 = vadd.f32 %v864_v52, %v814_v2  ;;  %v1263_v54 = vpop.f32.mrb[9].mxu0 }
 0x405   : > { %v867_v29 = vpop.f32.mrb[10].mxu0  ;;  %v1342_v54 = vld [vmem:[%s1679_s6 + $0x8] sm:$0xff] (!%p1197_p6)  }
 0x406   : > { %v1264_v55 = vpop.f32.mrb[11].mxu0  ;;  %v870_v56 = vsel %vm520_vm4, %v865_v53, 0.0  ;;  %v873_v57 = vmul.f32 %v865_v53, %v865_v53  ;;  %v976_v29 = vrot.slane (!%p1197_p6), %v1553_v40, %v1577_v23 }
 0x407   : > { %871 = vadd.xlane.f32.xlu1 %v870_v56 }
 0x408   : > { %v874_v58 = vsel %vm520_vm4, %v873_v57, 0.0 }
 0x40b   : > { %875 = vadd.xlane.f32.xlu1 %v874_v58 }
 0x419   : > { %901 = vperm.xlu0 %1322, %v461_v59  }
 0x48c   : > { %v700_v60 = vpop.xlane.xlu0 %699 }
 0x48d   : > { %v705_v61 = vmul.f32 0.0625, %v700_v60  ;;  %v1204_v60 = vld [vmem:[%s1684_s11] ss:$0 sm:$0xff] (!%p1197_p6) }
 0x48f   : > { %v707_v63 = vmul.f32 %v705_v61, %v705_v61  ;;  %v710_v17 = vsub.f32 %v693_v45, %v705_v61 }
 0x490   : > { %v704_v62 = vpop.xlane.xlu0 %703 }
 0x491   : > { %v706_v0 = vmul.f32 0.0625, %v704_v62 }
 0x493   : > { %v708_v1 = vsub.f32 %v706_v0, %v707_v63 }
 0x494   : > { %v872_v3 = vpop.xlane.xlu1 %871 }
 0x495   : > { %v709_v4 = vmax.f32 %v708_v1, 0.0  ;;  %v877_v5 = vmul.f32 0.0625, %v872_v3 }
 0x497   : > { %v711_v6 = vadd.f32 1e-05, %v709_v4  ;;  %v879_v11 = vmul.f32 %v877_v5, %v877_v5  ;;  %v882_v22 = vsub.f32 %v865_v53, %v877_v5 }
 0x498   : > { %v876_v10 = vpop.xlane.xlu1 %875  ;;  %v902_v37 = vpop.permute.xlu0 %901 }
 0x499   : > { %1335 = vrsqrt.f32 %v711_v6  ;;  %v878_v12 = vmul.f32 0.0625, %v876_v10 }
 0x49b   : > { %v880_v13 = vsub.f32 %v878_v12, %v879_v11 }
 0x49d   : > { %v881_v14 = vmax.f32 %v880_v13, 0.0 }
 0x49f   : > { %v883_v15 = vadd.f32 1e-05, %v881_v14 }
 0x4a1   : > { %1337 = vrsqrt.f32 %v883_v15 }
 0x4a3   : > { %v1336_v16 = vpop.eup %1335 }
 0x4a4   : > { %v713_v18 = vmul.f32 %v1336_v16, %v710_v17 }
 0x4a6   : > { %v718_v24 = vmul.f32 %v717_v19, %v713_v18 }
 0x4a8   : > { %v723_v33 = vadd.f32 %v722_v26, %v718_v24 }
 0x4aa   : > { %v724_v35 = vmax.f32 %v723_v33, 0.0 }
 0x4ab   : > { %v1338_v30 = vpop.eup %1337 }
 0x4ac   : > { %v885_v32 = vmul.f32 %v1338_v30, %v882_v22 }
 0x4ae   : > { %v890_v8 = vmul.f32 %v889_v27, %v885_v32 }
 0x4b0   : > { %v895_v34 = vadd.f32 %v894_v31, %v890_v8 }
 0x4b2   : > { %v896_v36 = vmax.f32 %v895_v34, 0.0 }
 0x4b4   : > { %v898_v38 = vsub.f32 %v896_v36, %v724_v35 }
 0x4b6   : > { %v904_v39 = vmul.f32 %v902_v37, %v898_v38  ;;  %911 = sbr.rel (%p1197_p6) target bundleno = 1871 (0x74f), region = 76 }
 0x4b8   : > { %v905_v41 = vadd.f32 %v904_v39, %v724_v35 }
 0x4ba   : > { %v906_v42 = vadd.f32 %v905_v41, %v897_v7 }
 0x4bc   : > { %907 = vst.msk [vmem:[#allocation2] sm:$0x3] %vm520_vm4, %v906_v42 }
 0x4c3   : > { %v912_v44 = vld [vmem:[#allocation2] sm:$0x3] }
 0x4c4   : > { %v915_v45 = vpack.c.bf16 %v912_v44, %v912_v44 }
 0x4c6   : > { %1268 = vmatmul.mubr.msk.bf16.vlgmr.msra.gmra.mrb[0].mxu0 %vm561_vm5, %v915_v45 }
 0x4c7   : > { %1281 = vmatprep.mubr.msk.bf16.mxu0 %vm1402_vm8, %v1401_v43  ;;  %1278 = vmatpush3.bf16.msra.mxu0 %v1341_v47 }
 0x4c8   : > { %1279 = vmatprep.subr.bf16.mxu0 %v1401_v43 }
 0x4cb   : > { %1280 = vmatpush3.bf16.msra.mxu0 %v1342_v54 }
 0x599   : > { %v963_v49 = vpop.f32.mrb[0].mxu0 }
 0x59a   : > { %v964_v50 = vadd.f32 %v963_v49, %v919_v48  ;;  %v1269_v2 = vpop.f32.mrb[1].mxu0 }
 0x59b   : > { %v966_v51 = vpop.f32.mrb[2].mxu0 }
 0x59c   : > { %v972_v52 = vpack.c.bf16 %v964_v50, %v964_v50  ;;  %v1270_v53 = vpop.f32.mrb[3].mxu0 }
 0x59e   : > { %1274 = vmatmul.mubr.msk.bf16.vlgmr.msra.gmra.mrb[0].mxu1 %vm561_vm5, %v972_v52 }
 0x671   : > { %v1020_v55 = vpop.f32.mrb[0].mxu1 }
 0x672   : > { %v1021_v56 = vadd.f32 %v1020_v55, %v976_v29  ;;  %v1275_v57 = vpop.f32.mrb[1].mxu1 }
 0x673   : > { %v1023_v9 = vpop.f32.mrb[2].mxu1 }
 0x674   : > { %v1026_v25 = vmax.f32 %v1021_v56, 0.0  ;;  %v1276_v58 = vpop.f32.mrb[3].mxu1 }
 0x676   : > { %v1031_v59 = vpack.c.bf16 %v1026_v25, %v1026_v25 }
 0x678   : > { %1282 = vmatmul.mubr.msk.bf16.vlgmr.msra.gmra.mrb[4].mxu0 %vm654_vm7, %v1031_v59 }
 0x74b   : > { %v1088_v61 = vpop.f32.mrb[4].mxu0 }
 0x74c   : > { %v1089_v62 = vadd.f32 %v1204_v60, %v1088_v61  ;;  %v1283_v63 = vpop.f32.mrb[5].mxu0 }
 0x74d   : > { %v1091_v0 = vpop.f32.mrb[6].mxu0 }
 0x74e   : > { %1095 = vst.msk [vmem:[#allocation3] sm:$0x3] %vm1094_vm9, %v1089_v62  ;;  %v1284_v40 = vpop.f32.mrb[7].mxu0 }
 0x74f PF: > { %p1638_p7 = scmp.eq.s32.totalorder %s1173_s24, 3  ;;  %s1403_s28 = smov [#allocation3]  }
 0x750   : > { %s1105_s29 = sshll.u32 %s1403_s28, 4  ;;  %s1106_s29 = int_to_ptr.vmem [resolvable:$true] %s1105_s29 }
 0x751   : > { %s1343_s30 = scalar_lea.vmem %s1106_s29, 32  ;;  %p1350_p11 = scmp.lt.s32.totalorder %s1106_s29, %s1106_s29 }
 0x752   : > { %p1344_p8 = scmp.ne.s32.totalorder %s1106_s29, %s1343_s30  ;;  %p1351_p12 = scmp.lt.s32.totalorder %s1343_s30, %s1343_s30 }
 0x754   : > { %p1345_p9 = pnand %p1344_p8, %p1638_p7  ;;  %p1352_p13 = por %p1351_p12, %p1350_p11 }
 0x756   : > { %p1346_p10 = pneg %p1345_p9 }
 0x758   : > { %p1353_p0 = pnand %p1352_p13, %p1346_p10 }
 0x75a   : > { %1356 = shalt.err (!%p1353_p0)
}
 0x75b   : > { %s1357_s24 = scalar_lea.hbm %s1685_s12, 32 }
 0x75c   : > { %p1358_p1 = scmp.ne.s32.totalorder %s1685_s12, %s1357_s24  ;;  %p1363_p4 = scmp.lt.u32.totalorder %s1357_s24, %s1685_s12 }
 0x75e   : > { %p1359_p2 = pnand %p1358_p1, %p1638_p7 }
 0x760   : > { %p1360_p3 = pneg %p1359_p2 }
 0x762   : > { %p1365_p5 = pnand %p1363_p4, %p1360_p3 }
 0x764   : > { %1368 = shalt.err (!%p1365_p5)
}
 0x765   : > { %1286 = dma.vmem_to_hbm [thread:$0]  (%p1638_p7), %s1106_s29, 32, %s1685_s12, [#allocation4]  }
 0x766   : > { %1382 = dma.done.wait (%p1638_p7), [#allocation4], 32  }
 0x767   : > { %1384 = vsyncadd (%p1638_p7), [#allocation4], 4294967264 }
 0x768 PF: > { %s23_s23 = sadd.s32 1, %s1395_s23   ;;  %s1687_s21 = smov %s1391_s22 }
 0x769   : > { %p20_p6 = scmp.ge.s32.totalorder %s23_s23, 6   ;;  %s1688_s22 = smov %s1690_s25 }
 0x76b   :  { %22 = sbr.rel (!%p20_p6) target bundleno = 2 (0x2), region = 110 }
 0x772   :  { %1118 = vsyncpa [#allocation4], 1 }
 0x773   :  { %1120 = vsyncpa [#allocation4 + $0x1], 1 }

</bundles_post_ra>
